<compile_context>
chip_gen: v7x
topology: tpu7x:2x2x1
jax: 0.10.0
libtpu: 0.0.40
codegen_flags: <defaults>
</compile_context>

<pallas_src>
import functools
import math

import jax
import jax.numpy as jnp
from jax.experimental import pallas as pl
from jax.experimental.pallas import tpu as pltpu

EPS = 1e-5          # HF CLIP layer_norm_eps
NORM_EPS = 1e-24    # eps^2 clamp for L2 normalisation (matches F.normalize eps=1e-12)
NEG_INF = -1e30
LOGIT_SCALE = math.exp(2.6592)          # CLIP logit_scale.exp()
VMEM_LIMIT = 48 * 1024 * 1024           # explicit scoped-VMEM budget (v7x has 64 MiB physical)


def _round_up(x, m):
    return ((x + m - 1) // m) * m


# ----------------------------------------------------------------- fused matmul
def _fused_matmul_kernel(*refs, has_ln, has_bias, has_res, act):
    it = iter(refs)
    x_ref = next(it)
    if has_ln:
        g_ref = next(it)
        bln_ref = next(it)
    w_ref = next(it)
    b_ref = next(it) if has_bias else None
    r_ref = next(it) if has_res else None
    o_ref = next(it)
    acc_ref = next(it)

    @pl.when(pl.program_id(2) == 0)
    def _():
        acc_ref[...] = jnp.zeros_like(acc_ref)

    if has_ln:
        x = x_ref[...].astype(jnp.float32)
        mu = jnp.mean(x, axis=-1, keepdims=True)
        var = jnp.mean(jnp.square(x - mu), axis=-1, keepdims=True)
        x = (x - mu) * jax.lax.rsqrt(var + EPS) * g_ref[...] + bln_ref[...]
        x_mm = x.astype(jnp.bfloat16)
    else:
        x_mm = x_ref[...].astype(jnp.bfloat16)

    acc_ref[...] += jnp.dot(x_mm, w_ref[...], preferred_element_type=jnp.float32)

    @pl.when(pl.program_id(2) == pl.num_programs(2) - 1)
    def _():
        y = acc_ref[...]
        if has_bias:
            y = y + b_ref[...]
        if act == "quick_gelu":          # CLIP quick_gelu: y * sigmoid(1.702 y)
            y = y * jax.nn.sigmoid(1.702 * y)
        if has_res:
            y = y + r_ref[...].astype(jnp.float32)
        o_ref[...] = y.astype(o_ref.dtype)


def fused_matmul(x, w, b=None, *, ln_g=None, ln_b=None, act=None, residual=None,
                 out_dtype=jnp.float32, tm=512, tn=1024, tk=1024):
    """y = [LN(x)] @ w [+ b] [quick_gelu] [+ residual]   with bf16 MXU / f32 accum.

    M/N (and K when no LN) are padded to tile multiples; tiles never collapse to
    full array dims, so pipelining and VMEM budgets hold at real CLIP shapes.
    """
    M, K = x.shape
    N = w.shape[1]
    has_ln = ln_g is not None
    has_bias = b is not None
    has_res = residual is not None

    TM = min(tm, _round_up(M, 8))
    Mp = _round_up(M, TM)
    TN = min(tn, _round_up(N, 128))
    Npad = _round_up(N, TN)
    if has_ln:
        # LayerNorm needs the true full feature row: never tile or pad K here.
        TK, Kp = K, K
    else:
        TK = min(tk, _round_up(K, 128))
        Kp = _round_up(K, TK)

    if Mp != M or Kp != K:
        x = jnp.pad(x, ((0, Mp - M), (0, Kp - K)))
    if Kp != K or Npad != N:
        w = jnp.pad(w, ((0, Kp - K), (0, Npad - N)))
    b2 = None
    if has_bias:
        b2 = b.reshape(1, N).astype(jnp.float32)
        if Npad != N:
            b2 = jnp.pad(b2, ((0, 0), (0, Npad - N)))
    res2 = None
    if has_res:
        res2 = residual
        if Mp != M or Npad != N:
            res2 = jnp.pad(res2, ((0, Mp - M), (0, Npad - N)))

    grid = (Mp // TM, Npad // TN, Kp // TK)

    in_specs = [pl.BlockSpec((TM, TK), lambda i, j, k: (i, k))]
    args = [x]
    if has_ln:
        in_specs += [pl.BlockSpec((1, K), lambda i, j, k: (0, 0)),
                     pl.BlockSpec((1, K), lambda i, j, k: (0, 0))]
        args += [ln_g.reshape(1, K).astype(jnp.float32),
                 ln_b.reshape(1, K).astype(jnp.float32)]
    in_specs += [pl.BlockSpec((TK, TN), lambda i, j, k: (k, j))]
    args += [w]
    if has_bias:
        in_specs += [pl.BlockSpec((1, TN), lambda i, j, k: (0, j))]
        args += [b2]
    if has_res:
        in_specs += [pl.BlockSpec((TM, TN), lambda i, j, k: (i, j))]
        args += [res2]

    kernel = functools.partial(_fused_matmul_kernel, has_ln=has_ln,
                               has_bias=has_bias, has_res=has_res, act=act)
    out = pl.pallas_call(
        kernel,
        out_shape=jax.ShapeDtypeStruct((Mp, Npad), out_dtype),
        grid=grid,
        in_specs=in_specs,
        out_specs=pl.BlockSpec((TM, TN), lambda i, j, k: (i, j)),
        scratch_shapes=[pltpu.VMEM((TM, TN), jnp.float32)],
        compiler_params=pltpu.CompilerParams(
            dimension_semantics=("parallel", "parallel", "arbitrary"),
            vmem_limit_bytes=VMEM_LIMIT),
    )(*args)
    if Mp != M or Npad != N:
        out = out[:M, :N]
    return out


# ------------------------------------------------ embeddings + pos-emb add + pre-LN
def _embed_ln_kernel(x_ref, pos_ref, g_ref, b_ref, o_ref):
    x = x_ref[0].astype(jnp.float32) + pos_ref[...]
    mu = jnp.mean(x, axis=-1, keepdims=True)
    var = jnp.mean(jnp.square(x - mu), axis=-1, keepdims=True)
    o_ref[0] = ((x - mu) * jax.lax.rsqrt(var + EPS) * g_ref[...]
                + b_ref[...]).astype(o_ref.dtype)


def embed_layernorm(x, pos, g, b):
    """pre_layrnorm(x + pos_emb): pos-add fused into the LN kernel, bf16 output."""
    B, S, E = x.shape
    return pl.pallas_call(
        _embed_ln_kernel,
        out_shape=jax.ShapeDtypeStruct((B, S, E), jnp.bfloat16),
        grid=(B,),
        in_specs=[pl.BlockSpec((1, S, E), lambda i: (i, 0, 0)),
                  pl.BlockSpec((S, E), lambda i: (0, 0)),
                  pl.BlockSpec((1, E), lambda i: (0, 0)),
                  pl.BlockSpec((1, E), lambda i: (0, 0))],
        out_specs=pl.BlockSpec((1, S, E), lambda i: (i, 0, 0)),
        compiler_params=pltpu.CompilerParams(
            dimension_semantics=("parallel",),
            vmem_limit_bytes=VMEM_LIMIT),
    )(x, pos.astype(jnp.float32),
      g.reshape(1, E).astype(jnp.float32), b.reshape(1, E).astype(jnp.float32))


# ------------------------------------ attention (per-head grid) + out-proj + residual
def _attn_kernel(q_ref, kT_ref, v_ref, res_ref, ow_ref, ob_ref, o_ref, acc_ref,
                 *, scale, s_real):
    h = pl.program_id(1)

    @pl.when(h == 0)
    def _():
        acc_ref[...] = jnp.zeros_like(acc_ref)

    q = q_ref[0, 0]                      # (S, Dh)  bf16
    kT = kT_ref[0, 0]                    # (Dh, Sk) bf16 — K already transposed
    v = v_ref[0, 0]                      # (Sk, Dh) bf16
    s = jnp.dot(q, kT, preferred_element_type=jnp.float32) * scale   # (S, Sk)
    sk = kT_ref.shape[-1]
    if sk > s_real:                      # mask padded key columns
        kidx = jax.lax.broadcasted_iota(jnp.int32, s.shape, 1)
        s = jnp.where(kidx < s_real, s, NEG_INF)
    s = s - jnp.max(s, axis=-1, keepdims=True)
    p = jnp.exp(s)
    p = p * pl.reciprocal(jnp.sum(p, axis=-1, keepdims=True), approx=True)
    ctx = jnp.dot(p.astype(jnp.bfloat16), v, preferred_element_type=jnp.float32)
    # accumulate this head's slice of the out-projection: ctx @ o_w[h*Dh:(h+1)*Dh, :]
    acc_ref[...] += jnp.dot(ctx.astype(jnp.bfloat16), ow_ref[0],
                            preferred_element_type=jnp.float32)

    @pl.when(h == pl.num_programs(1) - 1)
    def _():
        o_ref[0] = (acc_ref[...] + ob_ref[...]
                    + res_ref[0].astype(jnp.float32)).astype(o_ref.dtype)


def attention_block(q, kT, v, resid, o_w_heads, o_b):
    """Multi-head attention + out-projection + residual.  grid = (B, NH)."""
    B, NH, S, Dh = q.shape
    E = NH * Dh
    Sk = _round_up(S, 128)               # lane-dense score/prob matrices
    if Sk != S:
        kT = jnp.pad(kT, ((0, 0), (0, 0), (0, 0), (0, Sk - S)))
        v = jnp.pad(v, ((0, 0), (0, 0), (0, Sk - S), (0, 0)))

    kernel = functools.partial(_attn_kernel, scale=float(Dh) ** -0.5, s_real=S)
    return pl.pallas_call(
        kernel,
        out_shape=jax.ShapeDtypeStruct((B, S, E), jnp.bfloat16),
        grid=(B, NH),
        in_specs=[pl.BlockSpec((1, 1, S, Dh), lambda b, h: (b, h, 0, 0)),
                  pl.BlockSpec((1, 1, Dh, Sk), lambda b, h: (b, h, 0, 0)),
                  pl.BlockSpec((1, 1, Sk, Dh), lambda b, h: (b, h, 0, 0)),
                  pl.BlockSpec((1, S, E), lambda b, h: (b, 0, 0)),
                  pl.BlockSpec((1, Dh, E), lambda b, h: (h, 0, 0)),
                  pl.BlockSpec((1, E), lambda b, h: (0, 0))],
        out_specs=pl.BlockSpec((1, S, E), lambda b, h: (b, 0, 0)),
        scratch_shapes=[pltpu.VMEM((S, E), jnp.float32)],
        compiler_params=pltpu.CompilerParams(
            dimension_semantics=("parallel", "arbitrary"),
            vmem_limit_bytes=VMEM_LIMIT),
    )(q, kT, v, resid, o_w_heads, o_b.reshape(1, E).astype(jnp.float32))


# ----------------------------------------------------------------- fused zero-shot head
def _head_kernel(cls_ref, g_ref, b_ref, pw_ref, hw_ref, o_ref, emb_ref, *, logit_scale):
    # Compute post_layernorm(CLS) -> visual projection -> single L2 norm once.
    # (ZeroShotHead's own normalisation is idempotent on the unit-norm ZEROSHOT
    #  embedding, so only one L2 norm is kept.)
    @pl.when(pl.program_id(0) == 0)
    def _():
        x = cls_ref[...].astype(jnp.float32)
        mu = jnp.mean(x, axis=-1, keepdims=True)
        var = jnp.mean(jnp.square(x - mu), axis=-1, keepdims=True)
        xn = (x - mu) * jax.lax.rsqrt(var + EPS) * g_ref[...] + b_ref[...]
        proj = jnp.dot(xn.astype(jnp.bfloat16), pw_ref[...],
                       preferred_element_type=jnp.float32)
        emb = proj * jax.lax.rsqrt(
            jnp.maximum(jnp.sum(proj * proj, axis=-1, keepdims=True), NORM_EPS))
        emb_ref[...] = emb.astype(jnp.bfloat16)

    # ZeroShotHead.forward: F.linear(x/||x||, W) — logit scale applied to f32 logits.
    o_ref[...] = (jnp.dot(emb_ref[...], hw_ref[...],
                          preferred_element_type=jnp.float32)
                  * logit_scale).astype(o_ref.dtype)


def zero_shot_head(cls_tok, post_g, post_b, vis_proj_w, head_w, *, tn=2048):
    B, E = cls_tok.shape
    PROJ, NCLS = head_w.shape
    TN = min(tn, _round_up(NCLS, 128))
    Npad = _round_up(NCLS, TN)
    if Npad != NCLS:
        head_w = jnp.pad(head_w, ((0, 0), (0, Npad - NCLS)))

    kernel = functools.partial(_head_kernel, logit_scale=LOGIT_SCALE)
    out = pl.pallas_call(
        kernel,
        out_shape=jax.ShapeDtypeStruct((B, Npad), jnp.float32),
        grid=(Npad // TN,),
        in_specs=[pl.BlockSpec((B, E), lambda j: (0, 0)),
                  pl.BlockSpec((1, E), lambda j: (0, 0)),
                  pl.BlockSpec((1, E), lambda j: (0, 0)),
                  pl.BlockSpec((E, PROJ), lambda j: (0, 0)),
                  pl.BlockSpec((PROJ, TN), lambda j: (0, j))],
        out_specs=pl.BlockSpec((B, TN), lambda j: (0, j)),
        scratch_shapes=[pltpu.VMEM((B, PROJ), jnp.bfloat16)],
        # "arbitrary": the compute-once emb scratch is not megacore-safe under "parallel".
        compiler_params=pltpu.CompilerParams(
            dimension_semantics=("arbitrary",),
            vmem_limit_bytes=VMEM_LIMIT),
    )(cls_tok, post_g.reshape(1, E).astype(jnp.float32),
      post_b.reshape(1, E).astype(jnp.float32), vis_proj_w, head_w)
    return out[:, :NCLS] if Npad != NCLS else out


# ----------------------------------------------------------------- params
def init_params(key, cfg):
    C, P, E = cfg["channels"], cfg["patch_size"], cfg["hidden"]
    Np = (cfg["image_size"] // P) ** 2
    S = Np + 1
    MLP, PROJ, NCLS = cfg["mlp"], cfg["proj_dim"], cfg["num_classes"]

    def nrm(k, shape, scale=0.02):
        return scale * jax.random.normal(k, shape, jnp.float32)

    keys = iter(jax.random.split(key, 8 + 8 * cfg["layers"]))
    params = {
        "patch_w": nrm(next(keys), (C * P * P, E)).astype(jnp.bfloat16),
        "class_emb": nrm(next(keys), (E,)),
        "pos_emb": nrm(next(keys), (S, E)),
        "pre_ln_g": jnp.ones((E,), jnp.float32), "pre_ln_b": jnp.zeros((E,), jnp.float32),
        "post_ln_g": jnp.ones((E,), jnp.float32), "post_ln_b": jnp.zeros((E,), jnp.float32),
        "vis_proj_w": nrm(next(keys), (E, PROJ)).astype(jnp.bfloat16),
        "layers": [],
    }
    # ZeroShotHead weights: L2-normalised text embeddings, stored pre-transposed
    # (PROJ, NCLS) and UNSCALED in bf16; logit_scale.exp() is applied to the f32
    # logits in the head-kernel epilogue.
    hw = jax.random.normal(next(keys), (NCLS, PROJ), jnp.float32)
    hw = hw / jnp.linalg.norm(hw, axis=-1, keepdims=True)
    params["head_w"] = hw.T.astype(jnp.bfloat16)

    for _ in range(cfg["layers"]):
        qw = nrm(next(keys), (E, E))
        kw = nrm(next(keys), (E, E))
        vw = nrm(next(keys), (E, E))
        params["layers"].append({
            "ln1_g": jnp.ones((E,), jnp.float32), "ln1_b": jnp.zeros((E,), jnp.float32),
            "qkv_w": jnp.concatenate([qw, kw, vw], axis=1).astype(jnp.bfloat16),
            "qkv_b": jnp.zeros((3 * E,), jnp.float32),
            "o_w": nrm(next(keys), (E, E)).astype(jnp.bfloat16),
            "o_b": jnp.zeros((E,), jnp.float32),
            "ln2_g": jnp.ones((E,), jnp.float32), "ln2_b": jnp.zeros((E,), jnp.float32),
            "fc1_w": nrm(next(keys), (E, MLP)).astype(jnp.bfloat16),
            "fc1_b": jnp.zeros((MLP,), jnp.float32),
            "fc2_w": nrm(next(keys), (MLP, E)).astype(jnp.bfloat16),
            "fc2_b": jnp.zeros((E,), jnp.float32),
        })
    return params


# ----------------------------------------------------------------- forward
def clip_with_head_forward(pixel_values, params, cfg):
    B, C, H, W = pixel_values.shape
    P, E, NH = cfg["patch_size"], cfg["hidden"], cfg["heads"]
    Dh = E // NH
    Hp, Wp = H // P, W // P
    Np = Hp * Wp
    S = Np + 1

    # --- CLIPVisionEmbeddings: Conv2d(stride=patch) as patch-extract + matmul ---
    x = pixel_values.astype(jnp.float32).reshape(B, C, Hp, P, Wp, P)
    x = x.transpose(0, 2, 4, 1, 3, 5).reshape(B * Np, C * P * P)
    patch_emb = fused_matmul(x, params["patch_w"],
                             out_dtype=jnp.bfloat16).reshape(B, Np, E)
    cls = jnp.broadcast_to(params["class_emb"].astype(jnp.bfloat16), (B, 1, E))
    h_embed = jnp.concatenate([cls, patch_emb], axis=1)           # (B,S,E) bf16

    # pre-LN with the positional-embedding add fused in; bf16 hidden stream.
    hf = embed_layernorm(h_embed, params["pos_emb"],
                         params["pre_ln_g"], params["pre_ln_b"]).reshape(B * S, E)

    # --- CLIPEncoder layers ---
    for lyr in params["layers"]:
        qkv = fused_matmul(hf, lyr["qkv_w"], lyr["qkv_b"],
                           ln_g=lyr["ln1_g"], ln_b=lyr["ln1_b"],
                           out_dtype=jnp.bfloat16)                # LN1 + fused QKV
        qkv = qkv.reshape(B, S, 3, NH, Dh)
        q = jnp.transpose(qkv[:, :, 0], (0, 2, 1, 3))             # (B,NH,S,Dh)
        kT = jnp.transpose(qkv[:, :, 1], (0, 2, 3, 1))            # (B,NH,Dh,S) pre-transposed
        v = jnp.transpose(qkv[:, :, 2], (0, 2, 1, 3))             # (B,NH,S,Dh)
        hf = attention_block(q, kT, v, hf.reshape(B, S, E),
                             lyr["o_w"].reshape(NH, Dh, E), lyr["o_b"]
                             ).reshape(B * S, E)                  # attn + o_proj + resid
        h1 = fused_matmul(hf, lyr["fc1_w"], lyr["fc1_b"],
                          ln_g=lyr["ln2_g"], ln_b=lyr["ln2_b"],
                          act="quick_gelu", out_dtype=jnp.bfloat16)   # LN2 + fc1 + gelu
        hf = fused_matmul(h1, lyr["fc2_w"], lyr["fc2_b"], residual=hf,
                          out_dtype=jnp.bfloat16)                 # fc2 + resid

    last_hidden = hf.reshape(B, S, E)

    # --- post-LN(CLS) -> visual projection -> L2 norm -> ZeroShotHead (class-tiled) ---
    logits = zero_shot_head(last_hidden[:, 0, :], params["post_ln_g"],
                            params["post_ln_b"], params["vis_proj_w"],
                            params["head_w"])
    return logits


# ----------------------------------------------------------------- main
if __name__ == "__main__":
    cfg = dict(image_size=16, patch_size=4, channels=3, hidden=32, heads=4,
               layers=2, mlp=64, proj_dim=16, num_classes=5)

    key = jax.random.PRNGKey(0)
    k_img, k_par = jax.random.split(key)
    pixel_values = jax.random.normal(
        k_img, (2, cfg["channels"], cfg["image_size"], cfg["image_size"]), jnp.float32)
    params = init_params(k_par, cfg)

    logits = clip_with_head_forward(pixel_values, params, cfg)
    logits = jax.block_until_ready(logits)

    assert logits.shape == (2, cfg["num_classes"])
    assert bool(jnp.all(jnp.isfinite(logits)))
    print("KERNEL_OK")
</pallas_src>

<mosaic_0001>
module attributes {stable_mosaic.version = 11 : i64} {
  func.func @_fused_matmul_kernel(%arg0: i32, %arg1: i32, %arg2: i32, %arg3: memref<32x128xf32, #tpu.memory_space<vmem>>, %arg4: memref<128x128xbf16, #tpu.memory_space<vmem>>, %arg5: memref<32x128xbf16, #tpu.memory_space<vmem>>, %arg6: memref<32x128xf32, #tpu.memory_space<vmem>>) attributes {dimension_semantics = [#tpu.dimension_semantics<parallel>, #tpu.dimension_semantics<parallel>, #tpu.dimension_semantics<arbitrary>], iteration_bounds = array<i64: 1, 1, 1>, scalar_prefetch = 0 : i64, scratch_operands = 1 : i64, tpu.core_type = #tpu.core_type<tc>, window_params = [{transform_indices = @transform_0, window_bounds = array<i64: 32, 128>}, {transform_indices = @transform_1, window_bounds = array<i64: 128, 128>}, {transform_indices = @transform_2, window_bounds = array<i64: 32, 128>}]} {
    %c0_i32 = arith.constant 0 : i32
    %0 = arith.cmpi eq, %arg2, %c0_i32 : i32
    %1 = arith.extui %0 : i1 to i32
    %c0_i32_0 = arith.constant 0 : i32
    %2 = arith.cmpi ne, %1, %c0_i32_0 : i32
    scf.if %2 {
      %cst_10 = arith.constant 0.000000e+00 : f32
      %13 = vector.broadcast %cst_10 : f32 to vector<32x128xf32>
      %c0_11 = arith.constant 0 : index
      %c0_12 = arith.constant 0 : index
      %14 = vector.load %arg6[%c0_11, %c0_12] : memref<32x128xf32, #tpu.memory_space<vmem>>, vector<32x128xf32>
      tpu.vector_store %arg6[%c0_11, %c0_12], %13 {strides = array<i32>} : memref<32x128xf32, #tpu.memory_space<vmem>>, vector<32x128xf32>,
    } else {
    }
    %c0 = arith.constant 0 : index
    %c0_1 = arith.constant 0 : index
    %3 = vector.load %arg3[%c0, %c0_1] : memref<32x128xf32, #tpu.memory_space<vmem>>, vector<32x128xf32>
    %4 = arith.truncf %3 : vector<32x128xf32> to vector<32x128xbf16>
    %c0_2 = arith.constant 0 : index
    %c0_3 = arith.constant 0 : index
    %5 = vector.load %arg6[%c0_2, %c0_3] : memref<32x128xf32, #tpu.memory_space<vmem>>, vector<32x128xf32>
    %c0_4 = arith.constant 0 : index
    %c0_5 = arith.constant 0 : index
    %6 = vector.load %arg4[%c0_4, %c0_5] : memref<128x128xbf16, #tpu.memory_space<vmem>>, vector<128x128xbf16>
    %cst = arith.constant dense<0.000000e+00> : vector<32x128xf32>
    %7 = tpu.matmul %4, %6, %cst {dimension_numbers = #tpu.dot_dimension_numbers<[1], [0], [0], [1], [0, 0, 1, 1], [], []>} : vector<32x128xbf16>, vector<128x128xbf16>, vector<32x128xf32> -> vector<32x128xf32>
    %8 = arith.addf %5, %7 : vector<32x128xf32>
    %c0_6 = arith.constant 0 : index
    %c0_7 = arith.constant 0 : index
    %9 = vector.load %arg6[%c0_6, %c0_7] : memref<32x128xf32, #tpu.memory_space<vmem>>, vector<32x128xf32>
    tpu.vector_store %arg6[%c0_6, %c0_7], %8 {strides = array<i32>} : memref<32x128xf32, #tpu.memory_space<vmem>>, vector<32x128xf32>,
    %c0_i32_8 = arith.constant 0 : i32
    %10 = arith.cmpi eq, %arg2, %c0_i32_8 : i32
    %11 = arith.extui %10 : i1 to i32
    %c0_i32_9 = arith.constant 0 : i32
    %12 = arith.cmpi ne, %11, %c0_i32_9 : i32
    scf.if %12 {
      %c0_10 = arith.constant 0 : index
      %c0_11 = arith.constant 0 : index
      %13 = vector.load %arg6[%c0_10, %c0_11] : memref<32x128xf32, #tpu.memory_space<vmem>>, vector<32x128xf32>
      %14 = arith.truncf %13 : vector<32x128xf32> to vector<32x128xbf16>
      %c0_12 = arith.constant 0 : index
      %c0_13 = arith.constant 0 : index
      %15 = vector.load %arg5[%c0_12, %c0_13] : memref<32x128xbf16, #tpu.memory_space<vmem>>, vector<32x128xbf16>
      tpu.vector_store %arg5[%c0_12, %c0_13], %14 {strides = array<i32>} : memref<32x128xbf16, #tpu.memory_space<vmem>>, vector<32x128xbf16>,
    } else {
    }
    return
  }
  func.func @transform_0(%arg0: i32, %arg1: i32, %arg2: i32) -> (i32, i32) {
    %c0_i32 = arith.constant 0 : i32
    return %arg0, %arg2 : i32, i32
  }
  func.func @transform_1(%arg0: i32, %arg1: i32, %arg2: i32) -> (i32, i32) {
    %c0_i32 = arith.constant 0 : i32
    return %arg2, %arg1 : i32, i32
  }
  func.func @transform_2(%arg0: i32, %arg1: i32, %arg2: i32) -> (i32, i32) {
    %c0_i32 = arith.constant 0 : i32
    return %arg0, %arg1 : i32, i32
  }
}

</mosaic_0001>

<bundles_post_ra>
// kernel: tpu_custom_call.1
= control target key start
LH: loop header
LB: loop body
LE: loop exit
PB: predicated region body
PF: predicated region fallthrough
CT: control target
= control target key end

     0   :  { %7 = vsyncpa [#allocation4], 0  ;;  %s433_s0 = inlined_call_operand.hbm [shape: f32[32,128], index: 0, kind: input, shape index: {}]   ;;  %s434_s1 = inlined_call_operand.hbm [shape: bf16[128,128], index: 1, kind: input, shape index: {}]   ;;  %s435_s2 = inlined_call_operand.hbm [shape: bf16[32,128], index: 2, kind: output, shape index: {}]  }
   0x1   :  { %8 = vsyncpa [#allocation7], 0 }
   0x2   :  { %9 = vsyncpa [#allocation5], 0  ;;  %s369_s9 = smov [#allocation3]   ;;  %s297_s13 = scalar_lea.hbm %s433_s0, 512 }
   0x3   :  { %s15_s10 = sshll.u32 %s369_s9, 4  ;;  %p298_p0 = scmp.ne.s32.totalorder %s433_s0, %s297_s13  ;;  %s16_s10 = int_to_ptr.vmem [resolvable:$true] %s15_s10 }
   0x4   :  { %p301_p1 = scmp.lt.u32.totalorder %s297_s13, %s433_s0 }
   0x6   :  { %p303_p2 = pnand %p301_p1, %p298_p0 }
   0x8   :  { %306 = shalt.err (!%p303_p2)
}
   0x9   :  { %s307_s18 = scalar_lea.vmem %s16_s10, 512  ;;  %p312_p4 = scmp.lt.s32.totalorder %s16_s10, %s16_s10 }
   0xa   :  { %p308_p3 = scmp.ne.s32.totalorder %s16_s10, %s307_s18  ;;  %p313_p5 = scmp.lt.s32.totalorder %s307_s18, %s307_s18 }
   0xc   :  { %p314_p6 = por %p313_p5, %p312_p4 }
   0xe   :  { %p315_p7 = pnand %p314_p6, %p308_p3 }
  0x10   :  { %318 = shalt.err (!%p315_p7)
}
  0x11   :  { %s370_s19 = smov 128   ;;  %s371_s20 = smov 8  }
  0x12   :  { %21 = dma.hbm_to_vmem [thread:$0]  %s433_s0, 512, %s16_s10, [#allocation4], %s370_s19, %s370_s19, %s371_s20  }
  0x13   :  { %s372_s23 = smov [#allocation6]   ;;  %s319_s27 = scalar_lea.hbm %s434_s1, 1024 }
  0x14   :  { %s27_s24 = sshll.u32 %s372_s23, 4  ;;  %p320_p8 = scmp.ne.s32.totalorder %s434_s1, %s319_s27  ;;  %s28_s24 = int_to_ptr.vmem [resolvable:$true] %s27_s24 }
  0x15   :  { %p323_p9 = scmp.lt.u32.totalorder %s319_s27, %s434_s1 }
  0x17   :  { %p325_p10 = pnand %p323_p9, %p320_p8 }
  0x19   :  { %328 = shalt.err (!%p325_p10)
}
  0x1a   :  { %s329_s4 = scalar_lea.vmem %s28_s24, 1024  ;;  %p334_p12 = scmp.lt.s32.totalorder %s28_s24, %s28_s24 }
  0x1b   :  { %p330_p11 = scmp.ne.s32.totalorder %s28_s24, %s329_s4  ;;  %p335_p13 = scmp.lt.s32.totalorder %s329_s4, %s329_s4 }
  0x1d   :  { %p336_p0 = por %p335_p13, %p334_p12 }
  0x1f   :  { %p337_p1 = pnand %p336_p0, %p330_p11 }
  0x21   :  { %340 = shalt.err (!%p337_p1)
}
  0x22   :  { %s373_s0 = smov 64   ;;  %s374_s5 = smov 4  }
  0x23   :  { %33 = dma.hbm_to_vmem [thread:$0]  %s434_s1, 1024, %s28_s24, [#allocation7], %s373_s0, %s373_s0, %s374_s5  }
  0x24   :  { %363 = dma.done.wait [#allocation4], 512  }
  0x25   :  { %364 = vsyncadd [#allocation4], 4294966784 }
  0x26   :  { %365 = dma.done.wait [#allocation7], 1024  }
  0x27   :  { %366 = vsyncadd [#allocation7], 4294966272  ;;  %v289_v0 = vld [vmem:[#allocation6] sm:$0xff]   ;;  %v290_v1 = vld [vmem:[#allocation6 + $0x8] sm:$0xff]   ;;  %s375_s1 = smov [#allocation8]  }
  0x28   :  { %262 = vmatprep.subr.bf16.mxu0 %v289_v0  ;;  %v291_v2 = vld [vmem:[#allocation6 + $0x10] sm:$0xff]   ;;  %v292_v3 = vld [vmem:[#allocation6 + $0x18] sm:$0xff]   ;;  %v49_v4 = vld [vmem:[#allocation3] sm:$0xff]  ;;  %s212_s8 = sshll.u32 %s375_s1, 4  ;;  %s213_s8 = int_to_ptr.vmem [resolvable:$true] %s212_s8 }
  0x29   :  { %263 = vmatpush3.bf16.msra.mxu0 %v289_v0  ;;  %v50_v5 = vld [vmem:[#allocation3 + $0x8] sm:$0xff]  ;;  %v293_v7 = vld [vmem:[#allocation6 + $0x20] sm:$0xff]   ;;  %v295_v9 = vld [vmem:[#allocation6 + $0x30] sm:$0xff]   ;;  %s341_s9 = scalar_lea.vmem %s213_s8, 256  ;;  %p346_p3 = scmp.lt.s32.totalorder %s213_s8, %s213_s8 }
  0x2a   :  { %264 = vmatprep.subr.bf16.mxu0 %v290_v1  ;;  %v53_v6 = vpack.c.bf16 %v50_v5, %v49_v4  ;;  %v294_v8 = vld [vmem:[#allocation6 + $0x28] sm:$0xff]   ;;  %v296_v10 = vld [vmem:[#allocation6 + $0x38] sm:$0xff]   ;;  %v51_v11 = vld [vmem:[#allocation3 + $0x10] sm:$0xff]  ;;  %p342_p2 = scmp.ne.s32.totalorder %s213_s8, %s341_s9  ;;  %p347_p4 = scmp.lt.s32.totalorder %s341_s9, %s341_s9 }
  0x2b   :  { %v52_v12 = vld [vmem:[#allocation3 + $0x18] sm:$0xff] }
  0x2c   :  { %278 = vmatprep.mubr.bf16.mxu0 %v53_v6  ;;  %v54_v13 = vpack.c.bf16 %v52_v12, %v51_v11  ;;  %p348_p5 = por %p347_p4, %p346_p3 }
  0x2d   :  { %265 = vmatpush3.bf16.msra.mxu0 %v290_v1 }
  0x2e   :  { %266 = vmatprep.subr.bf16.mxu0 %v291_v2  ;;  %p349_p6 = pnand %p348_p5, %p342_p2 }
  0x31   :  { %267 = vmatpush3.bf16.msra.mxu0 %v291_v2 }
  0x32   :  { %268 = vmatprep.subr.bf16.mxu0 %v292_v3 }
  0x35   :  { %269 = vmatpush3.bf16.msra.mxu0 %v292_v3 }
  0x36   :  { %270 = vmatprep.subr.bf16.mxu0 %v293_v7 }
  0x39   :  { %271 = vmatpush3.bf16.msra.mxu0 %v293_v7 }
  0x3a   :  { %272 = vmatprep.subr.bf16.mxu0 %v294_v8 }
  0x3d   :  { %273 = vmatpush3.bf16.msra.mxu0 %v294_v8 }
  0x3e   :  { %274 = vmatprep.subr.bf16.mxu0 %v295_v9 }
  0x41   :  { %275 = vmatpush3.bf16.msra.mxu0 %v295_v9 }
  0x42   :  { %276 = vmatprep.subr.bf16.mxu0 %v296_v10 }
  0x45   :  { %277 = vmatpush3.bf16.msra.mxu0 %v296_v10 }
  0x48   :  { %279 = vmatmul.mubr.bf16.vlgmr.msra.gmra.mrb[0].mxu0 %v54_v13 }
 0x11b   :  { %v280_v14 = vpop.f32.mrb[0].mxu0 }
 0x11c   :  { %v157_v15 = vpop.f32.mrb[1].mxu0 }
 0x11d   :  { %v281_v16 = vpop.f32.mrb[2].mxu0 }
 0x11e   :  { %v249_v17 = vpack.c.bf16 %v281_v16, %v280_v14  ;;  %v160_v18 = vpop.f32.mrb[3].mxu0 }
 0x11f   :  { %v244_v19 = vpack.c.bf16 %v160_v18, %v157_v15 }
 0x120   :  { %251 = vst [vmem:[#allocation8 + $0x8] sm:$0xff] %v249_v17  }
 0x121   :  { %245 = vst [vmem:[#allocation8] sm:$0xff] %v244_v19  }
 0x122   :  { %352 = shalt.err (!%p349_p6)
}
 0x123   :  { %s353_s12 = scalar_lea.hbm %s435_s2, 256 }
 0x124   :  { %p354_p7 = scmp.ne.s32.totalorder %s435_s2, %s353_s12  ;;  %p357_p8 = scmp.lt.u32.totalorder %s353_s12, %s435_s2 }
 0x126   :  { %p359_p9 = pnand %p357_p8, %p354_p7 }
 0x128   :  { %362 = shalt.err (!%p359_p9)
}
 0x129   :  { %218 = dma.vmem_to_hbm [thread:$0]  %s213_s8, 256, %s435_s2, [#allocation5], %s373_s0, %s373_s0, %s374_s5  }
 0x12a   :  { %367 = dma.done.wait [#allocation5], 256  }
 0x12b   :  { %368 = vsyncadd [#allocation5], 4294967040 }
 0x12c   :  { %222 = vsyncpa [#allocation4], 1 }
 0x12d   :  { %223 = vsyncpa [#allocation7], 1 }
 0x12e   :  { %224 = vsyncpa [#allocation5], 1 }

</bundles_post_ra>
